<compile_context>
chip_gen: v5e
topology: v5e:2x2
jax: 0.10.0
libtpu: 0.0.40
codegen_flags: <defaults>
</compile_context>

<pallas_src>
import functools

import jax
import jax.numpy as jnp
from jax import lax
from jax.experimental import pallas as pl
from jax.experimental.pallas import tpu as pltpu

BLOCK_SIZE = 32
DROP_OUT = 0.2
HEAD_SIZE = 16
N_EMBD = 32
NUM_HEADS = 2  # n_embd // head_size: standard BigramLanguageModel configuration


def mha_kernel(x_ref, w_ref, b_ref, *rest, num_heads, head_size, scale,
               training, inv_keep):
    """Fused multi-head causal self-attention for one block of batch elements.

    x_ref    : (Bblk, T, C)           activations
    w_ref    : (C, H*3*hs)            fused, pre-transposed QKV weight (resident)
    b_ref    : (1, H*3*hs)            fused QKV bias (resident)
    mask_ref : (H, Bblk, T, T) int8   dropout keep mask (training only; 1 keep / 0 drop)
    o_ref    : (Bblk, T, H*hs)        concatenated head outputs
    """
    if training:
        mask_ref, o_ref = rest
    else:
        (o_ref,) = rest

    bblk, t, c = x_ref.shape

    # Single fused QKV projection for all heads and the whole batch block:
    # M = Bblk*T rows, N = H*3*hs columns -> one MXU matmul instead of H small ones.
    x2 = x_ref[...].reshape(bblk * t, c)
    qkv = jnp.dot(x2, w_ref[...], preferred_element_type=jnp.float32) + b_ref[...]
    qkv = qkv.reshape(bblk, t, num_heads * 3 * head_size)

    row = lax.broadcasted_iota(jnp.int32, (t, t), 0)
    col = lax.broadcasted_iota(jnp.int32, (t, t), 1)
    causal = col <= row                       # == tril[:T, :T]; broadcasts over batch
    neg_big = jnp.float32(-1e30)              # finite: robust even if a row were fully masked

    # TODO(synk): if T grows (>=1024), tile over the key axis (flash-style online
    # softmax) and set vmem_limit_bytes; the (T,T) slabs below assume toy sizes.
    outs = []
    # Static 2-iteration head loop; the attention math inside is batched over Bblk.
    # (Batching softmax across heads too would need a lane<->sublane transpose of
    #  q/k/v that costs more than it saves at H=2, hs=16.)
    for h in range(num_heads):
        off = 3 * head_size * h
        q = qkv[:, :, off:off + head_size]                       # (Bblk, T, hs)
        k = qkv[:, :, off + head_size:off + 2 * head_size]
        v = qkv[:, :, off + 2 * head_size:off + 3 * head_size]

        # wei = q @ k^T * C**-0.5   (scale uses C = n_embd, as in the PyTorch code)
        # TODO(synk): cast q/k/p/v to bf16 (f32 accumulate) on v6e/v7x once the
        # kernel stops being overhead-bound at larger T; kept f32 here to preserve
        # exact module semantics at toy sizes.
        s = jnp.einsum('bqd,bkd->bqk', q, k,
                       preferred_element_type=jnp.float32) * scale   # (Bblk, T, T)
        s = jnp.where(causal, s, neg_big)

        # Numerically-stable softmax; divide goes to the (otherwise idle) EUP.
        m = jnp.max(s, axis=-1, keepdims=True)
        e = jnp.exp(s - m)
        r = pl.reciprocal(jnp.sum(e, axis=-1, keepdims=True), approx=True)
        if training:
            r = r * inv_keep                  # fold 1/keep_prob into the tiny (B,T,1) tensor
        p = e * r
        if training:
            p = p * mask_ref[h].astype(jnp.float32)    # binary int8 keep mask

        outs.append(jnp.einsum('bqk,bkd->bqd', p, v,
                               preferred_element_type=jnp.float32))   # (Bblk, T, hs)

    # Single store of all heads at once (widest lane extent available at H*hs=32).
    o_ref[...] = jnp.concatenate(outs, axis=-1).astype(o_ref.dtype)


def _num_batch_blocks(batch):
    """1 grid step on single-TensorCore chips (v5e/v6e); 2 parallel steps on v7x."""
    try:
        kind = jax.devices()[0].device_kind.lower()
    except Exception:
        kind = ""
    if ("v7" in kind or "tpu7" in kind) and batch % 2 == 0:
        return 2
    return 1


def multi_head_attention(x, wq, wk, wv, bq, bk, bv, *, drop_mask=None,
                         drop_out=DROP_OUT):
    """x: (B, T, C); wq/wk/wv: (H, hs, C) PyTorch (out,in) layout; bq/bk/bv: (H, hs).
    drop_mask: optional (B, H, T, T) keep mask (training mode)."""
    B, T, C = x.shape
    H, hs, _ = wq.shape
    out_dim = H * hs
    training = drop_mask is not None

    # One-time wrapper-side packing: fuse per-head [Wq; Wk; Wv] across heads and
    # pre-transpose to (C, H*3*hs) so the in-kernel contraction is a plain x @ W
    # (no transposed-RHS orientation repeated B x H times inside the kernel).
    w_packed = jnp.concatenate([wq, wk, wv], axis=1)                    # (H, 3*hs, C)
    w_fused = jnp.transpose(w_packed, (2, 0, 1)).reshape(C, H * 3 * hs)  # (C, H*3*hs)
    b_fused = jnp.concatenate([bq, bk, bv], axis=1).reshape(1, H * 3 * hs)

    nblk = _num_batch_blocks(B)
    bblk = B // nblk

    kernel = functools.partial(
        mha_kernel, num_heads=H, head_size=hs, scale=float(C) ** -0.5,
        training=training, inv_keep=float(1.0 / (1.0 - drop_out)))

    in_specs = [
        pl.BlockSpec((bblk, T, C), lambda i: (i, 0, 0)),                # activations
        pl.BlockSpec((C, 3 * H * hs), lambda i: (0, 0)),                # fused weight (resident)
        pl.BlockSpec((1, 3 * H * hs), lambda i: (0, 0)),                # fused bias (resident)
    ]
    args = [x, w_fused, b_fused]

    mask_bytes = 0
    if training:
        # Binary int8 keep mask, head-major so the kernel slices on the leading axis.
        # 4x less HBM traffic than an f32 mask; 1/keep_prob folded in-kernel.
        # TODO(synk): replace with in-kernel pltpu.prng_seed/prng_random_bits +
        # uint32 threshold compare to drop the mask DMA entirely (kept host-provided
        # here so the result is deterministic and checkable against the reference).
        mask_i8 = jnp.transpose(drop_mask, (1, 0, 2, 3)).astype(jnp.int8)  # (H, B, T, T)
        in_specs.append(pl.BlockSpec((H, bblk, T, T), lambda i: (0, i, 0, 0)))
        args.append(mask_i8)
        mask_bytes = int(mask_i8.size)

    # Advisory cost estimate so XLA schedules this small custom call sensibly.
    flops = (2 * B * T * C * 3 * H * hs        # fused QKV projection
             + 4 * B * H * T * T * hs          # q@k^T and p@v
             + 8 * B * H * T * T)              # mask / softmax / dropout elementwise
    cost = pl.CostEstimate(
        flops=flops,
        transcendentals=B * H * T * T + B * H * T,          # exp + approx reciprocal
        bytes_accessed=(int(x.size) + int(w_fused.size) + int(b_fused.size)
                        + B * T * out_dim) * 4 + mask_bytes)

    return pl.pallas_call(
        kernel,
        out_shape=jax.ShapeDtypeStruct((B, T, out_dim), x.dtype),
        grid_spec=pltpu.PrefetchScalarGridSpec(
            num_scalar_prefetch=0,
            grid=(nblk,),
            in_specs=in_specs,
            # Single concatenated store per step; H*hs=32 lanes is the widest slab
            # these shapes allow without extra in-kernel transposes.
            out_specs=pl.BlockSpec((bblk, T, out_dim), lambda i: (i, 0, 0)),
        ),
        compiler_params=pltpu.CompilerParams(
            dimension_semantics=("parallel",)),
        cost_estimate=cost,
    )(*args)


def mha_reference(x, wq, wk, wv, bq, bk, bv, keep_mask=None, drop_out=DROP_OUT):
    """Pure-JAX reference mirroring the PyTorch module."""
    B, T, C = x.shape
    scale = float(C) ** -0.5
    tril = jnp.tril(jnp.ones((T, T), dtype=bool))
    outs = []
    for h in range(wq.shape[0]):
        q = x @ wq[h].T + bq[h]
        k = x @ wk[h].T + bk[h]
        v = x @ wv[h].T + bv[h]
        wei = jnp.einsum("btd,bsd->bts", q, k) * scale
        wei = jnp.where(tril, wei, -jnp.inf)
        wei = jax.nn.softmax(wei, axis=-1)
        if keep_mask is not None:
            wei = wei * keep_mask[:, h] * (1.0 / (1.0 - drop_out))
        outs.append(jnp.einsum("bts,bsd->btd", wei, v))
    return jnp.concatenate(outs, axis=-1)


if __name__ == "__main__":
    key = jax.random.PRNGKey(0)
    kx, kq, kk, kv, kbq, kbk, kbv, kd = jax.random.split(key, 8)

    B, T, C = 2, BLOCK_SIZE, N_EMBD
    H, hs = NUM_HEADS, HEAD_SIZE

    x = jax.random.normal(kx, (B, T, C), dtype=jnp.float32)

    # nn.Linear-style init: U(-1/sqrt(in), 1/sqrt(in)), in = n_embd.
    bound = 1.0 / float(C) ** 0.5
    wq = jax.random.uniform(kq, (H, hs, C), minval=-bound, maxval=bound, dtype=jnp.float32)
    wk = jax.random.uniform(kk, (H, hs, C), minval=-bound, maxval=bound, dtype=jnp.float32)
    wv = jax.random.uniform(kv, (H, hs, C), minval=-bound, maxval=bound, dtype=jnp.float32)
    bq = jax.random.uniform(kbq, (H, hs), minval=-bound, maxval=bound, dtype=jnp.float32)
    bk = jax.random.uniform(kbk, (H, hs), minval=-bound, maxval=bound, dtype=jnp.float32)
    bv = jax.random.uniform(kbv, (H, hs), minval=-bound, maxval=bound, dtype=jnp.float32)

    # --- Eval mode (dropout = identity) ---
    y_eval = multi_head_attention(x, wq, wk, wv, bq, bk, bv)
    jax.block_until_ready(y_eval)
    y_ref = mha_reference(x, wq, wk, wv, bq, bk, bv)
    assert y_eval.shape == (B, T, H * hs)
    assert jnp.allclose(y_eval, y_ref, atol=1e-2, rtol=1e-2), "eval mismatch vs reference"

    # --- Training mode (deterministic dropout keep mask generated host-side) ---
    keep = jax.random.bernoulli(kd, 1.0 - DROP_OUT, (B, H, T, T)).astype(jnp.float32)
    y_train = multi_head_attention(x, wq, wk, wv, bq, bk, bv, drop_mask=keep)
    jax.block_until_ready(y_train)
    y_train_ref = mha_reference(x, wq, wk, wv, bq, bk, bv, keep_mask=keep)
    assert y_train.shape == (B, T, H * hs)
    assert jnp.allclose(y_train, y_train_ref, atol=1e-2, rtol=1e-2), "train mismatch vs reference"

    print("KERNEL_OK")
</pallas_src>

<mosaic_0001>
module attributes {stable_mosaic.version = 11 : i64} {
  func.func @mha_kernel(%arg0: i32, %arg1: memref<2x32x32xf32, #tpu.memory_space<vmem>>, %arg2: memref<32x96xf32, #tpu.memory_space<vmem>>, %arg3: memref<1x96xf32, #tpu.memory_space<vmem>>, %arg4: memref<2x32x32xf32, #tpu.memory_space<vmem>>) attributes {dimension_semantics = [#tpu.dimension_semantics<parallel>], iteration_bounds = array<i64: 1>, scalar_prefetch = 0 : i64, scratch_operands = 0 : i64, tpu.core_type = #tpu.core_type<tc>, window_params = [{transform_indices = @transform_0, window_bounds = array<i64: 2, 32, 32>}, {pipeline_mode = #tpu.pipeline_mode<synchronous>, transform_indices = @transform_1, window_bounds = array<i64: 32, 96>}, {pipeline_mode = #tpu.pipeline_mode<synchronous>, transform_indices = @transform_2, window_bounds = array<i64: 1, 96>}, {transform_indices = @transform_3, window_bounds = array<i64: 2, 32, 32>}]} {
    %c0 = arith.constant 0 : index
    %c0_0 = arith.constant 0 : index
    %c0_1 = arith.constant 0 : index
    %0 = vector.load %arg1[%c0, %c0_0, %c0_1] : memref<2x32x32xf32, #tpu.memory_space<vmem>>, vector<2x32x32xf32>
    %1 = vector.shape_cast %0 : vector<2x32x32xf32> to vector<64x32xf32>
    %c0_2 = arith.constant 0 : index
    %c0_3 = arith.constant 0 : index
    %2 = vector.load %arg2[%c0_2, %c0_3] : memref<32x96xf32, #tpu.memory_space<vmem>>, vector<32x96xf32>
    %cst = arith.constant dense<0.000000e+00> : vector<64x96xf32>
    %3 = tpu.matmul %1, %2, %cst {dimension_numbers = #tpu.dot_dimension_numbers<[1], [0], [0], [1], [0, 0, 1, 1], [], []>} : vector<64x32xf32>, vector<32x96xf32>, vector<64x96xf32> -> vector<64x96xf32>
    %c0_4 = arith.constant 0 : index
    %c0_5 = arith.constant 0 : index
    %4 = vector.load %arg3[%c0_4, %c0_5] : memref<1x96xf32, #tpu.memory_space<vmem>>, vector<1x96xf32>
    %5 = vector.broadcast %4 : vector<1x96xf32> to vector<64x96xf32>
    %6 = arith.addf %3, %5 : vector<64x96xf32>
    %7 = vector.shape_cast %6 : vector<64x96xf32> to vector<2x32x96xf32>
    %8 = tpu.iota {dimensions = array<i32: 0>} : vector<32x32xi32>
    %9 = tpu.iota {dimensions = array<i32: 1>} : vector<32x32xi32>
    %10 = arith.cmpi sle, %9, %8 : vector<32x32xi32>
    %11 = vector.extract_strided_slice %7 {offsets = [0, 0, 0], sizes = [2, 32, 16], strides = [1, 1, 1]} : vector<2x32x96xf32> to vector<2x32x16xf32>
    %12 = vector.extract_strided_slice %7 {offsets = [0, 0, 16], sizes = [2, 32, 16], strides = [1, 1, 1]} : vector<2x32x96xf32> to vector<2x32x16xf32>
    %13 = vector.extract_strided_slice %7 {offsets = [0, 0, 32], sizes = [2, 32, 16], strides = [1, 1, 1]} : vector<2x32x96xf32> to vector<2x32x16xf32>
    "tpu.trace_start"() <{level = 10 : i32, message = "bqd,bkd->bqk"}> : () -> ()
    %cst_6 = arith.constant dense<0.000000e+00> : vector<2x32x32xf32>
    %14 = tpu.matmul %11, %12, %cst_6 {dimension_numbers = #tpu.dot_dimension_numbers<[2], [2], [1], [1], [0, 0, 0, 1, 1, 1], [0], [0]>} : vector<2x32x16xf32>, vector<2x32x16xf32>, vector<2x32x32xf32> -> vector<2x32x32xf32>
    "tpu.trace_stop"() : () -> ()
    %cst_7 = arith.constant 0.176776692 : f32
    %15 = vector.broadcast %cst_7 : f32 to vector<2x32x32xf32>
    %16 = arith.mulf %14, %15 : vector<2x32x32xf32>
    %cst_8 = arith.constant -1.000000e+30 : f32
    %17 = vector.shape_cast %10 : vector<32x32xi1> to vector<1x32x32xi1>
    %18 = vector.broadcast %17 : vector<1x32x32xi1> to vector<2x32x32xi1>
    %19 = vector.broadcast %cst_8 : f32 to vector<2x32x32xf32>
    %20 = arith.select %18, %16, %19 : vector<2x32x32xi1>, vector<2x32x32xf32>
    %cst_9 = arith.constant dense<0xFF800000> : vector<2x32xf32>
    %21 = vector.multi_reduction <maximumf>, %20, %cst_9 [2] : vector<2x32x32xf32> to vector<2x32xf32>
    %22 = vector.shape_cast %21 : vector<2x32xf32> to vector<2x32x1xf32>
    %23 = vector.broadcast %22 : vector<2x32x1xf32> to vector<2x32x32xf32>
    %24 = arith.subf %20, %23 : vector<2x32x32xf32>
    %25 = math.exp %24 : vector<2x32x32xf32>
    %cst_10 = arith.constant dense<0.000000e+00> : vector<2x32xf32>
    %26 = vector.multi_reduction <add>, %25, %cst_10 [2] : vector<2x32x32xf32> to vector<2x32xf32>
    %27 = vector.shape_cast %26 : vector<2x32xf32> to vector<2x32x1xf32>
    %28 = tpu.reciprocal %27 {approx = true} : vector<2x32x1xf32> -> vector<2x32x1xf32>
    %29 = vector.broadcast %28 : vector<2x32x1xf32> to vector<2x32x32xf32>
    %30 = arith.mulf %25, %29 : vector<2x32x32xf32>
    "tpu.trace_start"() <{level = 10 : i32, message = "bqk,bkd->bqd"}> : () -> ()
    %cst_11 = arith.constant dense<0.000000e+00> : vector<2x32x16xf32>
    %31 = tpu.matmul %30, %13, %cst_11 {dimension_numbers = #tpu.dot_dimension_numbers<[2], [1], [1], [2], [0, 0, 0, 1, 1, 2], [0], [0]>} : vector<2x32x32xf32>, vector<2x32x16xf32>, vector<2x32x16xf32> -> vector<2x32x16xf32>
    "tpu.trace_stop"() : () -> ()
    %32 = vector.extract_strided_slice %7 {offsets = [0, 0, 48], sizes = [2, 32, 16], strides = [1, 1, 1]} : vector<2x32x96xf32> to vector<2x32x16xf32>
    %33 = vector.extract_strided_slice %7 {offsets = [0, 0, 64], sizes = [2, 32, 16], strides = [1, 1, 1]} : vector<2x32x96xf32> to vector<2x32x16xf32>
    %34 = vector.extract_strided_slice %7 {offsets = [0, 0, 80], sizes = [2, 32, 16], strides = [1, 1, 1]} : vector<2x32x96xf32> to vector<2x32x16xf32>
    "tpu.trace_start"() <{level = 10 : i32, message = "bqd,bkd->bqk"}> : () -> ()
    %cst_12 = arith.constant dense<0.000000e+00> : vector<2x32x32xf32>
    %35 = tpu.matmul %32, %33, %cst_12 {dimension_numbers = #tpu.dot_dimension_numbers<[2], [2], [1], [1], [0, 0, 0, 1, 1, 1], [0], [0]>} : vector<2x32x16xf32>, vector<2x32x16xf32>, vector<2x32x32xf32> -> vector<2x32x32xf32>
    "tpu.trace_stop"() : () -> ()
    %cst_13 = arith.constant 0.176776692 : f32
    %36 = vector.broadcast %cst_13 : f32 to vector<2x32x32xf32>
    %37 = arith.mulf %35, %36 : vector<2x32x32xf32>
    %cst_14 = arith.constant -1.000000e+30 : f32
    %38 = vector.shape_cast %10 : vector<32x32xi1> to vector<1x32x32xi1>
    %39 = vector.broadcast %38 : vector<1x32x32xi1> to vector<2x32x32xi1>
    %40 = vector.broadcast %cst_14 : f32 to vector<2x32x32xf32>
    %41 = arith.select %39, %37, %40 : vector<2x32x32xi1>, vector<2x32x32xf32>
    %cst_15 = arith.constant dense<0xFF800000> : vector<2x32xf32>
    %42 = vector.multi_reduction <maximumf>, %41, %cst_15 [2] : vector<2x32x32xf32> to vector<2x32xf32>
    %43 = vector.shape_cast %42 : vector<2x32xf32> to vector<2x32x1xf32>
    %44 = vector.broadcast %43 : vector<2x32x1xf32> to vector<2x32x32xf32>
    %45 = arith.subf %41, %44 : vector<2x32x32xf32>
    %46 = math.exp %45 : vector<2x32x32xf32>
    %cst_16 = arith.constant dense<0.000000e+00> : vector<2x32xf32>
    %47 = vector.multi_reduction <add>, %46, %cst_16 [2] : vector<2x32x32xf32> to vector<2x32xf32>
    %48 = vector.shape_cast %47 : vector<2x32xf32> to vector<2x32x1xf32>
    %49 = tpu.reciprocal %48 {approx = true} : vector<2x32x1xf32> -> vector<2x32x1xf32>
    %50 = vector.broadcast %49 : vector<2x32x1xf32> to vector<2x32x32xf32>
    %51 = arith.mulf %46, %50 : vector<2x32x32xf32>
    "tpu.trace_start"() <{level = 10 : i32, message = "bqk,bkd->bqd"}> : () -> ()
    %cst_17 = arith.constant dense<0.000000e+00> : vector<2x32x16xf32>
    %52 = tpu.matmul %51, %34, %cst_17 {dimension_numbers = #tpu.dot_dimension_numbers<[2], [1], [1], [2], [0, 0, 0, 1, 1, 2], [0], [0]>} : vector<2x32x32xf32>, vector<2x32x16xf32>, vector<2x32x16xf32> -> vector<2x32x16xf32>
    "tpu.trace_stop"() : () -> ()
    %53 = tpu.concatenate %31, %52 in 2 : vector<2x32x16xf32>, vector<2x32x16xf32> -> vector<2x32x32xf32>
    %c0_18 = arith.constant 0 : index
    %c0_19 = arith.constant 0 : index
    %c0_20 = arith.constant 0 : index
    %54 = vector.load %arg4[%c0_18, %c0_19, %c0_20] : memref<2x32x32xf32, #tpu.memory_space<vmem>>, vector<2x32x32xf32>
    tpu.vector_store %arg4[%c0_18, %c0_19, %c0_20], %53 {strides = array<i32>} : memref<2x32x32xf32, #tpu.memory_space<vmem>>, vector<2x32x32xf32>,
    return
  }
  func.func @transform_0(%arg0: i32) -> (i32, i32, i32) {
    %c0_i32 = arith.constant 0 : i32
    %c0_i32_0 = arith.constant 0 : i32
    %c0_i32_1 = arith.constant 0 : i32
    return %arg0, %c0_i32, %c0_i32_0 : i32, i32, i32
  }
  func.func @transform_1(%arg0: i32) -> (i32, i32) {
    %c0_i32 = arith.constant 0 : i32
    %c0_i32_0 = arith.constant 0 : i32
    %c0_i32_1 = arith.constant 0 : i32
    return %c0_i32, %c0_i32_0 : i32, i32
  }
  func.func @transform_2(%arg0: i32) -> (i32, i32) {
    %c0_i32 = arith.constant 0 : i32
    %c0_i32_0 = arith.constant 0 : i32
    %c0_i32_1 = arith.constant 0 : i32
    return %c0_i32, %c0_i32_0 : i32, i32
  }
  func.func @transform_3(%arg0: i32) -> (i32, i32, i32) {
    %c0_i32 = arith.constant 0 : i32
    %c0_i32_0 = arith.constant 0 : i32
    %c0_i32_1 = arith.constant 0 : i32
    return %arg0, %c0_i32, %c0_i32_0 : i32, i32, i32
  }
}

</mosaic_0001>

<bundles_post_ra>
// kernel: tpu_custom_call.1
= control target key start
LH: loop header
LB: loop body
LE: loop exit
PB: predicated region body
PF: predicated region fallthrough
CT: control target
= control target key end

     0   :  { %8 = vsyncpa [#allocation3], 0  ;;  %s1559_s0 = inlined_call_operand.hbm [shape: f32[2,32,32], index: 0, kind: input, shape index: {}]   ;;  %s1560_s1 = inlined_call_operand.hbm [shape: f32[32,96], index: 1, kind: input, shape index: {}]   ;;  %s1561_s2 = inlined_call_operand.vmem [shape: f32[1,96], index: 2, kind: input, shape index: {}]   ;;  %s1562_s3 = inlined_call_operand.hbm [shape: f32[2,32,32], index: 3, kind: output, shape index: {}]  }
   0x1   :  { %9 = vsyncpa [#allocation6], 0 }
   0x2   :  { %10 = vsyncpa [#allocation4], 0  ;;  %s15_s14 = sshll.u32 %s1559_s0, 4  ;;  %s1131_s15 = smov [#allocation2]   ;;  %s16_s14 = int_to_ptr.hbm [resolvable:$true] %s15_s14 }
   0x3   :  { %s17_s16 = sshll.u32 %s1131_s15, 4  ;;  %s28_s19 = sshll.u32 %s1560_s1, 4  ;;  %s18_s16 = int_to_ptr.vmem [resolvable:$true] %s17_s16  ;;  %s29_s19 = int_to_ptr.hbm [resolvable:$true] %s28_s19 }
   0x4   :  { %s1132_s20 = smov 128   ;;  %s1133_s21 = smov 8  }
   0x5   :  { %23 = dma.hbm_to_vmem [thread:$0]  %s16_s14, 1024, %s18_s16, [#allocation3], %s1132_s20, %s1132_s20, %s1133_s21  }
   0x6   :  { %s1134_s22 = smov [#allocation5]  }
   0x7   :  { %s30_s23 = sshll.u32 %s1134_s22, 4  ;;  %s31_s23 = int_to_ptr.vmem [resolvable:$true] %s30_s23 }
   0x8   :  { %36 = dma.hbm_to_vmem [thread:$0]  %s29_s19, 512, %s31_s23, [#allocation6], %s1132_s20, %s1132_s20, %s1133_s21  }
   0x9   :  { %1125 = dma.done.wait [#allocation3], 1024  }
   0xa   :  { %1126 = vsyncadd [#allocation3], 4294966272 }
   0xb   :  { %1127 = dma.done.wait [#allocation6], 512  }
   0xc   :  { %1128 = vsyncadd [#allocation6], 4294966784  ;;  %v58_v0 = vld [vmem:[#allocation5 + $0x18] sm:$0xff]  ;;  %v57_v1 = vld [vmem:[#allocation5 + $0x10] sm:$0xff]  ;;  %vm63_vm0 = vcmask 261120   ;;  %s1135_s24 = smov 112   ;;  %v129_v57 = vlaneseq }
   0xd   :  { %100 = vmatpush.msra.mxu0 %v58_v0  ;;  %v56_v2 = vld [vmem:[#allocation5 + $0x8] sm:$0xff]  ;;  %v55_v3 = vld [vmem:[#allocation5] sm:$0xff]  ;;  %v49_v6 = vld [vmem:[#allocation2 + $0x10] sm:$0xff]  ;;  %s1137_s25 = smov 80   ;;  %s1138_s26 = smov 96   ;;  %vm152_vm1 = vcmask 130048  }
   0xe   :  { %v47_v4 = vld [vmem:[#allocation2] sm:$0xff]  ;;  %v48_v5 = vld [vmem:[#allocation2 + $0x8] sm:$0xff]  ;;  %v50_v7 = vld [vmem:[#allocation2 + $0x18] sm:$0xff]  ;;  %v1268_v58 = vshrl.u32 %v129_v57, 7  ;;  %v1270_v59 = vand.u32 127, %v129_v57  ;;  %s1139_s27 = smov 48  }
   0xf   :  { %101 = vmatpush.msra.mxu0 %v57_v1  ;;  %v51_v8 = vld [vmem:[#allocation2 + $0x20] sm:$0xff]  ;;  %v52_v9 = vld [vmem:[#allocation2 + $0x28] sm:$0xff]  ;;  %v53_v10 = vld [vmem:[#allocation2 + $0x30] sm:$0xff]  ;;  %s1140_s28 = smov 16   ;;  %s1141_s29 = smov [#allocation7]  }
  0x10   :  { %v54_v11 = vld [vmem:[#allocation2 + $0x38] sm:$0xff]  ;;  %v988_v13 = vld [vmem:[%s1561_s2] ss:$0 sm:$0xff]  ;;  %s1136_s2 = smov 64   ;;  %vm136_vm2 = vcmp.le.s32.totalorder %v1270_v59, %v1268_v58  ;;  %v1282_v0 = vadd.s32 8, %v1268_v58  ;;  %s857_s30 = sshll.u32 %s1141_s29, 4  ;;  %s858_s30 = int_to_ptr.vmem [resolvable:$true] %s857_s30 }
  0x11   :  { %102 = vmatpush.msra.mxu0 %v56_v2  ;;  %s859_s6 = sshll.u32 %s1562_s3, 4  ;;  %s860_s6 = int_to_ptr.hbm [resolvable:$true] %s859_s6 }
  0x12   :  { %vm137_vm3 = vcmp.le.s32.totalorder %v1270_v59, %v1282_v0 }
  0x13   :  { %103 = vmatpush.msra.mxu0 %v55_v3 }
  0x14   :  { %873 = vmatmul.msk.f32.vlgmr.msra.gmra.mxu0 %vm63_vm0, %v47_v4 }
  0x1c   :  { %874 = vmatmul.msk.f32.gmra.mxu0 %vm63_vm0, %v48_v5  ;;  %v1294_v5 = vadd.s32 16, %v1268_v58 }
  0x1e   :  { %vm138_vm4 = vcmp.le.s32.totalorder %v1270_v59, %v1294_v5 }
  0x24   :  { %875 = vmatmul.msk.f32.gmra.mxu0 %vm63_vm0, %v49_v6 }
  0x2c   :  { %876 = vmatmul.msk.f32.gmra.mxu0 %vm63_vm0, %v50_v7 }
  0x34   :  { %877 = vmatmul.msk.f32.gmra.mxu0 %vm63_vm0, %v51_v8 }
  0x3c   :  { %878 = vmatmul.msk.f32.gmra.mxu0 %vm63_vm0, %v52_v9 }
  0x44   :  { %879 = vmatmul.msk.f32.gmra.mxu0 %vm63_vm0, %v53_v10 }
  0x4c   :  { %880 = vmatmul.msk.f32.gmra.mxu0 %vm63_vm0, %v54_v11  ;;  %v1306_v11 = vadd.s32 24, %v1268_v58 }
  0x4e   :  { %vm139_vm5 = vcmp.le.s32.totalorder %v1270_v59, %v1306_v11 }
  0x91   :  { %v105_v12 = vpop.f32.mrf.mxu0 }
  0x92   :  { %v1188_v17 = vadd.f32 %v988_v13, %v105_v12 }
  0x99   :  { %v108_v14 = vpop.f32.mrf.mxu0 }
  0x9a   :  { %v1185_v15 = vadd.f32 %v988_v13, %v108_v14 }
  0x9c   :  { %146 = vrot.lane.b32.xlu1 %v1185_v15, %s1135_s24  ;;  %v1310_v12 = vpack.i.bf16 %v1188_v17, %v1185_v15 }
  0xa1   :  { %v111_v16 = vpop.f32.mrf.mxu0 }
  0xa2   :  { %v1194_v21 = vadd.f32 %v988_v13, %v111_v16 }
  0xa4   :  { %144 = vrot.lane.b32.xlu1 %v1188_v17, %s1135_s24 }
  0xa9   :  { %v114_v18 = vpop.f32.mrf.mxu0 }
  0xaa   :  { %v1191_v19 = vadd.f32 %v988_v13, %v114_v18 }
  0xac   :  { %150 = vrot.lane.b32.xlu0 %v1191_v19, %s1135_s24  ;;  %v948_v29 = vpack.i.bf16 %v1194_v21, %v1191_v19 }
  0xb1   :  { %v117_v20 = vpop.f32.mrf.mxu0 }
  0xb2   :  { %v1196_v22 = vadd.f32 %v988_v13, %v117_v20 }
  0xb4   :  { %148 = vrot.lane.b32.xlu0 %v1194_v21, %s1135_s24  ;;  %202 = vrot.lane.b32.xlu1 %v1196_v22, %s1135_s24 }
  0xb9   :  { %v120_v23 = vpop.f32.mrf.mxu0 }
  0xba   :  { %v1200_v24 = vadd.f32 %v988_v13, %v120_v23 }
  0xbc   :  { %204 = vrot.lane.b32.xlu0 %v1200_v24, %s1135_s24  ;;  %544 = vrot.lane.b32.xlu1 %v1200_v24, %s1136_s2  ;;  %v973_v5 = vpack.i.bf16 %v1191_v19, %v1200_v24 }
  0xc1   :  { %v123_v25 = vpop.f32.mrf.mxu0 }
  0xc2   :  { %v1204_v26 = vadd.f32 %v988_v13, %v123_v25 }
  0xc4   :  { %546 = vrot.lane.b32.xlu0 %v1204_v26, %s1136_s2  ;;  %534 = vrot.lane.b32.xlu1 %v1196_v22, %s1137_s25 }
  0xc9   :  { %v126_v27 = vpop.f32.mrf.mxu0 }
  0xca   :  { %v1208_v28 = vadd.f32 %v988_v13, %v126_v27 }
  0xcc   :  { %208 = vrot.lane.b32.xlu2 %v1208_v28, %s1135_s24  ;;  %542 = vrot.lane.b32.xlu0 %v1196_v22, %s1136_s2 }
  0xcd   :  { %536 = vrot.lane.b32.xlu1 %v1200_v24, %s1137_s25 }
  0xd4   :  { %206 = vrot.lane.b32.xlu2 %v1204_v26, %s1135_s24  ;;  %483 = vrot.lane.b32.xlu0 %v1185_v15, %s1136_s2 }
  0xd5   :  { %538 = vrot.lane.b32.xlu1 %v1204_v26, %s1137_s25 }
  0xdc   :  { %548 = vrot.lane.b32.xlu2 %v1208_v28, %s1136_s2  ;;  %473 = vrot.lane.b32.xlu0 %v1188_v17, %s1137_s25 }
  0xdd   :  { %477 = vrot.lane.b32.xlu1 %v1194_v21, %s1137_s25 }
  0xe4   :  { %487 = vrot.lane.b32.xlu2 %v1191_v19, %s1136_s2  ;;  %540 = vrot.lane.b32.xlu0 %v1208_v28, %s1137_s25 }
  0xe5   :  { %949 = vrot.lane.b32.xlu1 %v948_v29, %s1138_s26 }
  0xec   :  { %485 = vrot.lane.b32.xlu2 %v1194_v21, %s1136_s2 }
  0xf4   :  { %481 = vrot.lane.b32.xlu2 %v1188_v17, %s1136_s2 }
  0xfc   :  { %475 = vrot.lane.b32.xlu2 %v1185_v15, %s1137_s25 }
 0x104   :  { %479 = vrot.lane.b32.xlu2 %v1191_v19, %s1137_s25 }
 0x10e   :  { %v147_v30 = vpop.permute.xlu1 %146 }
 0x116   :  { %v145_v32 = vpop.permute.xlu1 %144 }
 0x11e   :  { %v151_v31 = vpop.permute.xlu0 %150 }
 0x11f   :  { %881 = vmatpush.xpose.msk.msra.mxu1 %vm152_vm1, %v151_v31 }
 0x126   :  { %v209_v33 = vpop.permute.xlu2 %208  ;;  %v149_v34 = vpop.permute.xlu0 %148 }
 0x127   :  { %v203_v35 = vpop.permute.xlu1 %202  ;;  %882 = vmatpush.xpose.msk.msra.mxu1 %vm152_vm1, %v149_v34  ;;  %889 = vmatpush.xpose.msk.msra.mxu2 %vm152_vm1, %v209_v33 }
 0x12b   :  { %883 = vmatpush.xpose.msk.msra.mxu1 %vm152_vm1, %v147_v30 }
 0x12e   :  { %v207_v36 = vpop.permute.xlu2 %206  ;;  %v205_v37 = vpop.permute.xlu0 %204 }
 0x12f   :  { %v545_v38 = vpop.permute.xlu1 %544  ;;  %884 = vmatpush.xpose.msk.msra.mxu1 %vm152_vm1, %v145_v32  ;;  %890 = vmatpush.xpose.msk.msra.mxu2 %vm152_vm1, %v207_v36 }
 0x132   :  { %885 = vmatmul.msk.f32.vlgmr.msra.gmra.mxu1 %vm152_vm1, %v1188_v17  ;;  %v958_v17 = vpack.i.bf16 %v1204_v26, %v1208_v28 }
 0x133   :  { %891 = vmatpush.xpose.msk.msra.mxu2 %vm152_vm1, %v205_v37 }
 0x136   :  { %v549_v39 = vpop.permute.xlu2 %548  ;;  %v547_v40 = vpop.permute.xlu0 %546 }
 0x137   :  { %v535_v41 = vpop.permute.xlu1 %534  ;;  %892 = vmatpush.xpose.msk.msra.mxu2 %vm152_vm1, %v203_v35 }
 0x13a   :  { %886 = vmatmul.msk.f32.gmra.mxu1 %vm152_vm1, %v1185_v15  ;;  %893 = vmatmul.msk.f32.vlgmr.msra.gmra.mxu2 %vm152_vm1, %v1196_v22 }
 0x13b   :  { %913 = vmatpush.xpose.msk.msrb.mxu2 %vm152_vm1, %v549_v39 }
 0x13e   :  { %v488_v42 = vpop.permute.xlu2 %487  ;;  %v543_v43 = vpop.permute.xlu0 %542 }
 0x13f   :  { %914 = vmatpush.xpose.msk.msrb.mxu2 %vm152_vm1, %v547_v40  ;;  %v537_v44 = vpop.permute.xlu1 %536  ;;  %905 = vmatpush.xpose.msk.msrb.mxu1 %vm152_vm1, %v488_v42 }
 0x142   :  { %887 = vmatmul.msk.f32.gmra.mxu1 %vm152_vm1, %v1194_v21  ;;  %894 = vmatmul.msk.f32.gmra.mxu2 %vm152_vm1, %v1200_v24 }
 0x143   :  { %915 = vmatpush.xpose.msk.msrb.mxu2 %vm152_vm1, %v545_v38 }
 0x146   :  { %v486_v45 = vpop.permute.xlu2 %485  ;;  %v484_v46 = vpop.permute.xlu0 %483 }
 0x147   :  { %916 = vmatpush.xpose.msk.msrb.mxu2 %vm152_vm1, %v543_v43  ;;  %v539_v47 = vpop.permute.xlu1 %538  ;;  %906 = vmatpush.xpose.msk.msrb.mxu1 %vm152_vm1, %v486_v45 }
 0x14a   :  { %888 = vmatmul.msk.f32.gmra.mxu1 %vm152_vm1, %v1191_v19  ;;  %895 = vmatmul.msk.f32.gmra.mxu2 %vm152_vm1, %v1204_v26 }
 0x14b   :  { %907 = vmatpush.xpose.msk.msrb.mxu1 %vm152_vm1, %v484_v46 }
 0x14e   :  { %v482_v48 = vpop.permute.xlu2 %481  ;;  %v474_v50 = vpop.permute.xlu0 %473 }
 0x14f   :  { %v478_v49 = vpop.permute.xlu1 %477  ;;  %908 = vmatpush.xpose.msk.msrb.mxu1 %vm152_vm1, %v482_v48 }
 0x152   :  { %896 = vmatmul.msk.f32.gmra.mxu2 %vm152_vm1, %v1208_v28  ;;  %909 = vmatmul.msk.f32.vlgmr.msrb.gmra.mxu1 %vm152_vm1, %v474_v50 }
 0x156   :  { %v476_v53 = vpop.permute.xlu2 %475  ;;  %v541_v56 = vpop.permute.xlu0 %540 }
 0x157   :  { %v950_v51 = vpop.permute.xlu1 %949 }
 0x158   :  { %v951_v52 = vunpack.i.l.bf16 %v950_v51  ;;  %v952_v54 = vunpack.i.h.bf16 %v950_v51 }
 0x15a   :  { %403 = vmatpush.msra.mxu3 %v951_v52  ;;  %910 = vmatmul.msk.f32.gmra.mxu1 %vm152_vm1, %v476_v53 }
 0x15b   :  { %917 = vmatmul.msk.f32.vlgmr.msrb.gmra.mxu2 %vm152_vm1, %v535_v41 }
 0x15c   :  { %404 = vmatpush.msra.mxu3 %v952_v54 }
 0x15e   :  { %v480_v55 = vpop.permute.xlu2 %479 }
 0x162   :  { %911 = vmatmul.msk.f32.gmra.mxu1 %vm152_vm1, %v478_v49 }
 0x163   :  { %918 = vmatmul.msk.f32.gmra.mxu2 %vm152_vm1, %v537_v44 }
 0x16a   :  { %912 = vmatmul.msk.f32.gmra.mxu1 %vm152_vm1, %v480_v55 }
 0x16b   :  { %919 = vmatmul.msk.f32.gmra.mxu2 %vm152_vm1, %v539_v47 }
 0x173   :  { %920 = vmatmul.msk.f32.gmra.mxu2 %vm152_vm1, %v541_v56 }
 0x1af   :  { %v186_v60 = vpop.f32.mrf.mxu1 }
 0x1b0   :  { %v255_v61 = vmul.f32 0.17677669, %v186_v60 }
 0x1b2   :  { %v1277_v62 = vsel %vm136_vm2, %v255_v61, -1e+30 }
 0x1b3   :  { %v279_v63 = vsel %vm63_vm0, %v1277_v62, -inf }
 0x1b4   :  { %280 = vmax.xlane.f32.xlu0 %v279_v63 }
 0x1b7   :  { %v189_v1 = vpop.f32.mrf.mxu1 }
 0x1b8   :  { %v256_v2 = vmul.f32 0.17677669, %v189_v1 }
 0x1ba   :  { %v1289_v3 = vsel %vm137_vm3, %v256_v2, -1e+30 }
 0x1bb   :  { %v282_v4 = vsel %vm63_vm0, %v1289_v3, -inf }
 0x1bc   :  { %283 = vmax.xlane.f32.xlu1 %v282_v4 }
 0x1bd   :  { %v243_v9 = vpop.f32.mrf.mxu2 }
 0x1be   :  { %v259_v36 = vmul.f32 0.17677669, %v243_v9 }
 0x1bf   :  { %v192_v6 = vpop.f32.mrf.mxu1 }
 0x1c0   :  { %v257_v7 = vmul.f32 0.17677669, %v192_v6  ;;  %v1350_v41 = vsel %vm136_vm2, %v259_v36, -1e+30 }
 0x1c1   :  { %v291_v43 = vsel %vm63_vm0, %v1350_v41, -inf }
 0x1c2   :  { %v1301_v8 = vsel %vm138_vm4, %v257_v7, -1e+30 }
 0x1c3   :  { %v285_v10 = vsel %vm63_vm0, %v1301_v8, -inf }
 0x1c4   :  { %286 = vmax.xlane.f32.xlu2 %v285_v10 }
 0x1c5   :  { %v246_v20 = vpop.f32.mrf.mxu2 }
 0x1c6   :  { %v260_v49 = vmul.f32 0.17677669, %v246_v20 }
 0x1c7   :  { %v195_v13 = vpop.f32.mrf.mxu1 }
 0x1c8   :  { %v258_v14 = vmul.f32 0.17677669, %v195_v13  ;;  %954 = vrot.lane.b32.xlu0 %v1310_v12, %s1138_s26  ;;  %v1378_v54 = vsel %vm137_vm3, %v260_v49, -1e+30 }
 0x1c9   :  { %v294_v56 = vsel %vm63_vm0, %v1378_v54, -inf }
 0x1ca   :  { %v1319_v16 = vsel %vm139_vm5, %v258_v14, -1e+30 }
 0x1cb   :  { %v288_v18 = vsel %vm63_vm0, %v1319_v16, -inf }
 0x1cc   :  { %289 = vmax.xlane.f32.xlu2 %v288_v18 }
 0x1cd   :  { %v249_v23 = vpop.f32.mrf.mxu2 }
 0x1ce   :  { %v261_v31 = vmul.f32 0.17677669, %v249_v23 }
 0x1cf   :  { %v522_v15 = vpop.f32.mrf.mxu1 }
 0x1d0   :  { %v1336_v26 = vsel %vm138_vm4, %v261_v31, -1e+30  ;;  %v595_v44 = vmul.f32 0.17677669, %v522_v15 }
 0x1d1   :  { %v297_v33 = vsel %vm63_vm0, %v1336_v26, -inf }
 0x1d2   :  { %v1364_v48 = vsel %vm136_vm2, %v595_v44, -1e+30 }
 0x1d3   :  { %v611_v51 = vsel %vm63_vm0, %v1364_v48, -inf }
 0x1d5   :  { %959 = vrot.lane.b32.xlu1 %v958_v17, %s1138_s26  ;;  %v252_v28 = vpop.f32.mrf.mxu2 }
 0x1d6   :  { %v262_v40 = vmul.f32 0.17677669, %v252_v28 }
 0x1d7   :  { %v525_v25 = vpop.f32.mrf.mxu1 }
 0x1d8   :  { %v596_v27 = vmul.f32 0.17677669, %v525_v25  ;;  %v1355_v42 = vsel %vm139_vm5, %v262_v40, -1e+30 }
 0x1d9   :  { %v300_v45 = vsel %vm63_vm0, %v1355_v42, -inf }
 0x1da   :  { %v1329_v29 = vsel %vm137_vm3, %v596_v27, -1e+30 }
 0x1db   :  { %v614_v30 = vsel %vm63_vm0, %v1329_v29, -inf }
 0x1dc   :  { %615 = vmax.xlane.f32.xlu2 %v614_v30 }
 0x1de   :  { %v583_v38 = vpop.f32.mrf.mxu2 }
 0x1df   :  { %v528_v32 = vpop.f32.mrf.mxu1  ;;  %v599_v46 = vmul.f32 0.17677669, %v583_v38 }
 0x1e0   :  { %v597_v52 = vmul.f32 0.17677669, %v528_v32 }
 0x1e1   :  { %v1369_v50 = vsel %vm136_vm2, %v599_v46, -1e+30 }
 0x1e2   :  { %v623_v53 = vsel %vm63_vm0, %v1369_v50, -inf  ;;  %v1385_v57 = vsel %vm138_vm4, %v597_v52, -1e+30 }
 0x1e3   :  { %v617_v61 = vsel %vm63_vm0, %v1385_v57, -inf }
 0x1e4   :  { %298 = vmax.xlane.f32.xlu2 %v297_v33 }
 0x1e6   :  { %v586_v47 = vpop.f32.mrf.mxu2 }
 0x1e7   :  { %v531_v34 = vpop.f32.mrf.mxu1  ;;  %v600_v55 = vmul.f32 0.17677669, %v586_v47 }
 0x1e8   :  { %v598_v35 = vmul.f32 0.17677669, %v531_v34 }
 0x1e9   :  { %v1390_v60 = vsel %vm137_vm3, %v600_v55, -1e+30 }
 0x1ea   :  { %v1343_v37 = vsel %vm139_vm5, %v598_v35, -1e+30  ;;  %v626_v63 = vsel %vm63_vm0, %v1390_v60, -inf }
 0x1eb   :  { %v620_v39 = vsel %vm63_vm0, %v1343_v37, -inf }
 0x1ec   :  { %621 = vmax.xlane.f32.xlu2 %v620_v39 }
 0x1ee   :  { %v589_v58 = vpop.f32.mrf.mxu2 }
 0x1ef   :  { %v601_v1 = vmul.f32 0.17677669, %v589_v58 }
 0x1f1   :  { %v1399_v2 = vsel %vm138_vm4, %v601_v1, -1e+30 }
 0x1f2   :  { %292 = vmax.xlane.f32.xlu0 %v291_v43  ;;  %v629_v0 = vsel %vm63_vm0, %v1399_v2, -inf }
 0x1f4   :  { %301 = vmax.xlane.f32.xlu2 %v300_v45 }
 0x1f6   :  { %v592_v4 = vpop.f32.mrf.mxu2 }
 0x1f7   :  { %v602_v6 = vmul.f32 0.17677669, %v592_v4 }
 0x1f9   :  { %v1406_v7 = vsel %vm139_vm5, %v602_v6, -1e+30 }
 0x1fa   :  { %612 = vmax.xlane.f32.xlu0 %v611_v51  ;;  %v632_v9 = vsel %vm63_vm0, %v1406_v7, -inf }
 0x1fc   :  { %624 = vmax.xlane.f32.xlu2 %v623_v53 }
 0x1ff   :  { %295 = vmax.xlane.f32.xlu1 %v294_v56 }
 0x202   :  { %618 = vmax.xlane.f32.xlu0 %v617_v61 }
 0x204   :  { %627 = vmax.xlane.f32.xlu2 %v626_v63 }
 0x20c   :  { %630 = vmax.xlane.f32.xlu2 %v629_v0 }
 0x214   :  { %633 = vmax.xlane.f32.xlu2 %v632_v9 }
 0x218   :  { %969 = vrot.lane.b32.xlu1 %v958_v17, %s1139_s27 }
 0x220   :  { %974 = vrot.lane.b32.xlu1 %v973_v5, %s1139_s27 }
 0x227   :  { %v281_v10 = vpop.xlane.xlu0 %280 }
 0x228   :  { %v303_v13 = vsub.f32 %v1277_v62, %v281_v10 }
 0x22a   :  { %v311_v14 = vmul.f32 1.442695, %v303_v13 }
 0x22c   :  { %989 = vpow2.f32 %v311_v14 }
 0x22f   :  { %v284_v59 = vpop.xlane.xlu1 %283 }
 0x230   :  { %v304_v11 = vsub.f32 %v1289_v3, %v284_v59 }
 0x232   :  { %v1416_v18 = vpop.eup %989  ;;  %v313_v20 = vmul.f32 1.442695, %v304_v11 }
 0x233   :  { %v327_v15 = vsel %vm63_vm0, %v1416_v18, 0.0 }
 0x234   :  { %991 = vpow2.f32 %v313_v20  ;;  %328 = vadd.xlane.f32.xlu0 %v327_v15 }
 0x237   :  { %v287_v17 = vpop.xlane.xlu2 %286 }
 0x238   :  { %v305_v19 = vsub.f32 %v1301_v8, %v287_v17  ;;  %v963_v8 = vpack.i.bf16 %v1196_v22, %v1200_v24 }
 0x23a   :  { %v1421_v23 = vpop.eup %991  ;;  %v955_v25 = vpop.permute.xlu0 %954  ;;  %v315_v30 = vmul.f32 1.442695, %v305_v19  ;;  %v978_v19 = vpack.i.bf16 %v1194_v21, %v1196_v22 }
 0x23b   :  { %v330_v62 = vsel %vm63_vm0, %v1421_v23, 0.0  ;;  %v956_v27 = vunpack.i.l.bf16 %v955_v25  ;;  %v957_v3 = vunpack.i.h.bf16 %v955_v25 }
 0x23c   :  { %331 = vadd.xlane.f32.xlu2 %v330_v62  ;;  %993 = vpow2.f32 %v315_v30 }
 0x23d   :  { %405 = vmatpush.msra.mxu3 %v956_v27 }
 0x23f   :  { %v290_v31 = vpop.xlane.xlu2 %289  ;;  %406 = vmatpush.msra.mxu3 %v957_v3 }
 0x240   :  { %v306_v32 = vsub.f32 %v1319_v16, %v290_v31 }
 0x242   :  { %v317_v28 = vmul.f32 1.442695, %v306_v32  ;;  %v1426_v33 = vpop.eup %993 }
 0x243   :  { %v333_v36 = vsel %vm63_vm0, %v1426_v33, 0.0 }
 0x244   :  { %995 = vpow2.f32 %v317_v28 }
 0x247   :  { %v960_v34 = vpop.permute.xlu1 %959 }
 0x248   :  { %964 = vrot.lane.b32.xlu0 %v963_v8, %s1138_s26  ;;  %v961_v35 = vunpack.i.l.bf16 %v960_v34  ;;  %v962_v39 = vunpack.i.h.bf16 %v960_v34 }
 0x24a   :  { %v1433_v38 = vpop.eup %995  ;;  %334 = vadd.xlane.f32.xlu1 %v333_v36  ;;  %456 = vmatpush.msrb.mxu3 %v961_v35 }
 0x24b   :  { %v336_v16 = vsel %vm63_vm0, %v1433_v38, 0.0 }
 0x24c   :  { %337 = vadd.xlane.f32.xlu2 %v336_v16  ;;  %457 = vmatpush.msrb.mxu3 %v962_v39 }
 0x24f   :  { %v1437_v40 = vpop.xlane.xlu2 %615 }
 0x250   :  { %v636_v39 = vsub.f32 %v1329_v29, %v1437_v40 }
 0x252   :  { %v645_v16 = vmul.f32 1.442695, %v636_v39 }
 0x257   :  { %v299_v24 = vpop.xlane.xlu2 %298 }
 0x258   :  { %v309_v4 = vsub.f32 %v1336_v26, %v299_v24 }
 0x25a   :  { %v323_v5 = vmul.f32 1.442695, %v309_v4 }
 0x25f   :  { %v622_v43 = vpop.xlane.xlu2 %621 }
 0x265   :  { %v293_v44 = vpop.xlane.xlu0 %292 }
 0x266   :  { %v307_v45 = vsub.f32 %v1350_v41, %v293_v44 }
 0x267   :  { %v302_v46 = vpop.xlane.xlu2 %301 }
 0x268   :  { %v319_v47 = vmul.f32 1.442695, %v307_v45  ;;  %v310_v14 = vsub.f32 %v1355_v42, %v302_v46 }
 0x26a   :  { %997 = vpow2.f32 %v319_v47  ;;  %v325_v11 = vmul.f32 1.442695, %v310_v14 }
 0x26d   :  { %v613_v49 = vpop.xlane.xlu0 %612 }
 0x26e   :  { %v635_v51 = vsub.f32 %v1364_v48, %v613_v49 }
 0x26f   :  { %v625_v52 = vpop.xlane.xlu2 %624 }
 0x270   :  { %v1441_v53 = vpop.eup %997  ;;  %v643_v55 = vmul.f32 1.442695, %v635_v51  ;;  %v639_v6 = vsub.f32 %v1369_v50, %v625_v52 }
 0x271   :  { %v339_v56 = vsel %vm63_vm0, %v1441_v53, 0.0 }
 0x272   :  { %999 = vpow2.f32 %v643_v55  ;;  %340 = vadd.xlane.f32.xlu1 %v339_v56  ;;  %v296_v58 = vpop.xlane.xlu1 %295 }
 0x273   :  { %v308_v61 = vsub.f32 %v1378_v54, %v296_v58  ;;  %v651_v54 = vmul.f32 1.442695, %v639_v6 }
 0x275   :  { %v321_v63 = vmul.f32 1.442695, %v308_v61  ;;  %v619_v13 = vpop.xlane.xlu0 %618 }
 0x276   :  { %v637_v59 = vsub.f32 %v1385_v57, %v619_v13  ;;  %v638_v57 = vsub.f32 %v1343_v37, %v622_v43 }
 0x277   :  { %v628_v41 = vpop.xlane.xlu2 %627  ;;  %1001 = vpow2.f32 %v321_v63 }
 0x278   :  { %v1446_v1 = vpop.eup %999  ;;  %v640_v48 = vsub.f32 %v1390_v60, %v628_v41  ;;  %v647_v15 = vmul.f32 1.442695, %v637_v59  ;;  %v649_v31 = vmul.f32 1.442695, %v638_v57 }
 0x279   :  { %v659_v0 = vsel %vm63_vm0, %v1446_v1, 0.0 }
 0x27a   :  { %v653_v9 = vmul.f32 1.442695, %v640_v48  ;;  %660 = vadd.xlane.f32.xlu2 %v659_v0 }
 0x27c   :  { %1003 = vpow2.f32 %v653_v9 }
 0x27d   :  { %v1453_v10 = vpop.eup %1001  ;;  %1005 = vpow2.f32 %v323_v5 }
 0x27e   :  { %v342_v26 = vsel %vm63_vm0, %v1453_v10, 0.0  ;;  %1007 = vpow2.f32 %v651_v54 }
 0x27f   :  { %1009 = vpow2.f32 %v325_v11  ;;  %v631_v36 = vpop.xlane.xlu2 %630 }
 0x280   :  { %1011 = vpow2.f32 %v647_v15 }
 0x281   :  { %1013 = vpow2.f32 %v649_v31 }
 0x282   :  { %v1458_v60 = vpop.eup %1003  ;;  %343 = vadd.xlane.f32.xlu2 %v342_v26 }
 0x283   :  { %v674_v50 = vsel %vm63_vm0, %v1458_v60, 0.0  ;;  %v1463_v20 = vpop.eup %1005 }
 0x284   :  { %675 = vadd.xlane.f32.xlu0 %v674_v50  ;;  %v1465_v17 = vpop.eup %1007  ;;  %v345_v42 = vsel %vm63_vm0, %v1463_v20, 0.0 }
 0x285   :  { %v671_v27 = vsel %vm63_vm0, %v1465_v17, 0.0  ;;  %v1475_v3 = vpop.eup %1009 }
 0x286   :  { %v1477_v32 = vpop.eup %1011  ;;  %v348_v21 = vsel %vm63_vm0, %v1475_v3, 0.0 }
 0x287   :  { %v665_v28 = vsel %vm63_vm0, %v1477_v32, 0.0  ;;  %v1483_v34 = vpop.eup %1013  ;;  %v634_v24 = vpop.xlane.xlu2 %633 }
 0x288   :  { %v668_v35 = vsel %vm63_vm0, %v1483_v34, 0.0  ;;  %v642_v63 = vsub.f32 %v1406_v7, %v634_v24 }
 0x28a   :  { %346 = vadd.xlane.f32.xlu2 %v345_v42  ;;  %v970_v25 = vpop.permute.xlu1 %969  ;;  %v657_v4 = vmul.f32 1.442695, %v642_v63 }
 0x28b   :  { %v971_v62 = vunpack.i.l.bf16 %v970_v25  ;;  %979 = vrot.lane.b32.xlu1 %v978_v19, %s1139_s27  ;;  %v972_v30 = vunpack.i.h.bf16 %v970_v25 }
 0x28c   :  { %672 = vadd.xlane.f32.xlu0 %v671_v27 }
 0x28d   :  { %788 = vmatpush.msra.mxu2 %v971_v62 }
 0x28f   :  { %789 = vmatpush.msra.mxu2 %v972_v30 }
 0x292   :  { %349 = vadd.xlane.f32.xlu2 %v348_v21  ;;  %v975_v22 = vpop.permute.xlu1 %974 }
 0x293   :  { %v976_v37 = vunpack.i.l.bf16 %v975_v22  ;;  %v977_v8 = vunpack.i.h.bf16 %v975_v22 }
 0x294   :  { %666 = vadd.xlane.f32.xlu0 %v665_v28 }
 0x295   :  { %735 = vmatpush.msrb.mxu0 %v977_v8  ;;  %929 = vmatpush.msra.mxu1 %v977_v8 }
 0x296   :  { %790 = vmatpush.msra.mxu2 %v976_v37 }
 0x29c   :  { %669 = vadd.xlane.f32.xlu0 %v668_v35 }
 0x2a7   :  { %v329_v43 = vpop.xlane.xlu0 %328 }
 0x2a8   :  { %1015 = vrcp.f32 %v329_v43 }
 0x2a9   :  { %1017 = vpow2.f32 %v645_v16 }
 0x2aa   :  { %984 = vrot.lane.b32.xlu2 %v1310_v12, %s1139_s27 }
 0x2ae   :  { %v1016_v44 = vpop.eup %1015 }
 0x2af   :  { %v332_v45 = vpop.xlane.xlu2 %331  ;;  %v359_v46 = vmul.f32 %v1016_v44, %v1416_v18  ;;  %v1492_v47 = vpop.eup %1017  ;;  %v641_v18 = vsub.f32 %v1399_v2, %v631_v36 }
 0x2b0   :  { %1019 = vrcp.f32 %v332_v45  ;;  %v662_v29 = vsel %vm63_vm0, %v1492_v47, 0.0 }
 0x2b1   :  { %897 = vmatmul.msk.f32.vlgmr.msra.gmra.mxu3 %vm63_vm0, %v359_v46  ;;  %v655_v61 = vmul.f32 1.442695, %v641_v18 }
 0x2b5   :  { %663 = vadd.xlane.f32.xlu1 %v662_v29 }
 0x2b6   :  { %v1020_v40 = vpop.eup %1019 }
 0x2b7   :  { %v360_v49 = vmul.f32 %v1020_v40, %v1421_v23 }
 0x2b9   :  { %898 = vmatmul.msk.f32.gmra.mxu3 %vm63_vm0, %v360_v49 }
 0x2ba   :  { %v965_v12 = vpop.permute.xlu0 %964 }
 0x2bb   :  { %v966_v51 = vunpack.i.l.bf16 %v965_v12  ;;  %v967_v55 = vunpack.i.h.bf16 %v965_v12 }
 0x2bd   :  { %v335_v52 = vpop.xlane.xlu1 %334  ;;  %458 = vmatpush.msrb.mxu3 %v966_v51 }
 0x2be   :  { %1021 = vrcp.f32 %v335_v52 }
 0x2bf   :  { %459 = vmatpush.msrb.mxu3 %v967_v55  ;;  %v338_v56 = vpop.xlane.xlu2 %337 }
 0x2c0   :  { %1023 = vrcp.f32 %v338_v56 }
 0x2c1   :  { %933 = vmatpush.msra.mxu3 %v971_v62  ;;  %1025 = vpow2.f32 %v655_v61 }
 0x2c2   :  { %1027 = vpow2.f32 %v657_v4 }
 0x2c3   :  { %934 = vmatpush.msra.mxu3 %v972_v30 }
 0x2c4   :  { %v1022_v58 = vpop.eup %1021 }
 0x2c5   :  { %935 = vmatpush.msra.mxu3 %v976_v37  ;;  %v361_v23 = vmul.f32 %v1022_v58, %v1426_v33 }
 0x2c6   :  { %v1024_v41 = vpop.eup %1023 }
 0x2c7   :  { %899 = vmatmul.msk.f32.gmra.mxu3 %vm63_vm0, %v361_v23  ;;  %v362_v48 = vmul.f32 %v1024_v41, %v1433_v38  ;;  %v1504_v0 = vpop.eup %1025 }
 0x2c8   :  { %v677_v2 = vsel %vm63_vm0, %v1504_v0, 0.0  ;;  %v1509_v6 = vpop.eup %1027 }
 0x2c9   :  { %v680_v33 = vsel %vm63_vm0, %v1509_v6, 0.0 }
 0x2cf   :  { %900 = vmatmul.msk.f32.gmra.mxu3 %vm63_vm0, %v362_v48 }
 0x2d3   :  { %678 = vadd.xlane.f32.xlu2 %v677_v2 }
 0x2db   :  { %681 = vadd.xlane.f32.xlu2 %v680_v33 }
 0x2e5   :  { %v341_v7 = vpop.xlane.xlu1 %340 }
 0x2e6   :  { %1029 = vrcp.f32 %v341_v7 }
 0x2ec   :  { %v1030_v9 = vpop.eup %1029 }
 0x2ed   :  { %v661_v5 = vpop.xlane.xlu2 %660  ;;  %v363_v38 = vmul.f32 %v1030_v9, %v1441_v53 }
 0x2ef   :  { %901 = vmatmul.msk.f32.vlgmr.msrb.gmra.mxu3 %vm63_vm0, %v363_v38 }
 0x2f5   :  { %v344_v54 = vpop.xlane.xlu2 %343 }
 0x2f6   :  { %1031 = vrcp.f32 %v344_v54 }
 0x2f7   :  { %v676_v13 = vpop.xlane.xlu0 %675 }
 0x2fc   :  { %v1032_v14 = vpop.eup %1031 }
 0x2fd   :  { %v347_v26 = vpop.xlane.xlu2 %346  ;;  %v980_v59 = vpop.permute.xlu1 %979  ;;  %v364_v50 = vmul.f32 %v1032_v14, %v1453_v10 }
 0x2fe   :  { %1033 = vrcp.f32 %v347_v26  ;;  %v981_v11 = vunpack.i.l.bf16 %v980_v59  ;;  %v982_v15 = vunpack.i.h.bf16 %v980_v59 }
 0x2ff   :  { %v673_v42 = vpop.xlane.xlu0 %672  ;;  %902 = vmatmul.msk.f32.gmra.mxu3 %vm63_vm0, %v364_v50 }
 0x300   :  { %1035 = vrcp.f32 %v673_v42  ;;  %736 = vmatpush.msrb.mxu0 %v982_v15  ;;  %930 = vmatpush.msra.mxu1 %v982_v15 }
 0x301   :  { %791 = vmatpush.msra.mxu2 %v981_v11  ;;  %936 = vmatpush.msra.mxu3 %v981_v11 }
 0x304   :  { %v1034_v53 = vpop.eup %1033 }
 0x305   :  { %v350_v19 = vpop.xlane.xlu2 %349  ;;  %v365_v57 = vmul.f32 %v1034_v53, %v1463_v20 }
 0x306   :  { %v1036_v25 = vpop.eup %1035  ;;  %1037 = vrcp.f32 %v350_v19 }
 0x307   :  { %v695_v62 = vmul.f32 %v1036_v25, %v1465_v17  ;;  %v667_v10 = vpop.xlane.xlu0 %666  ;;  %903 = vmatmul.msk.f32.gmra.mxu3 %vm63_vm0, %v365_v57  ;;  %1039 = vrcp.f32 %v661_v5 }
 0x308   :  { %1041 = vrcp.f32 %v676_v13 }
 0x309   :  { %925 = vmatmul.msk.f32.vlgmr.msra.gmra.mxu2 %vm63_vm0, %v695_v62 }
 0x30c   :  { %v1038_v27 = vpop.eup %1037 }
 0x30d   :  { %v985_v30 = vpop.permute.xlu2 %984  ;;  %v366_v31 = vmul.f32 %v1038_v27, %v1475_v3  ;;  %v1040_v21 = vpop.eup %1039 }
 0x30e   :  { %v986_v22 = vunpack.i.l.bf16 %v985_v30  ;;  %v987_v20 = vunpack.i.h.bf16 %v985_v30  ;;  %v691_v17 = vmul.f32 %v1040_v21, %v1446_v1  ;;  %v1042_v28 = vpop.eup %1041 }
 0x30f   :  { %v670_v37 = vpop.xlane.xlu0 %669  ;;  %904 = vmatmul.msk.f32.gmra.mxu3 %vm63_vm0, %v366_v31  ;;  %v696_v8 = vmul.f32 %v1042_v28, %v1458_v60 }
 0x310   :  { %1043 = vrcp.f32 %v670_v37  ;;  %737 = vmatpush.msrb.mxu0 %v986_v22  ;;  %931 = vmatpush.msra.mxu1 %v986_v22 }
 0x312   :  { %738 = vmatpush.msrb.mxu0 %v987_v20  ;;  %932 = vmatpush.msra.mxu1 %v987_v20 }
 0x313   :  { %921 = vmatmul.msk.f32.vlgmr.msrb.gmra.mxu0 %vm63_vm0, %v691_v17 }
 0x316   :  { %v1044_v35 = vpop.eup %1043 }
 0x317   :  { %v694_v3 = vmul.f32 %v1044_v35, %v1483_v34  ;;  %926 = vmatmul.msk.f32.vlgmr.msra.gmra.mxu3 %vm63_vm0, %v696_v8 }
 0x319   :  { %924 = vmatmul.msk.f32.vlgmr.msra.gmra.mxu1 %vm63_vm0, %v694_v3 }
 0x328   :  { %v664_v36 = vpop.xlane.xlu1 %663 }
 0x329   :  { %1045 = vrcp.f32 %v664_v36 }
 0x32a   :  { %1047 = vrcp.f32 %v667_v10 }
 0x32f   :  { %v1046_v39 = vpop.eup %1045 }
 0x330   :  { %v692_v1 = vmul.f32 %v1046_v39, %v1492_v47  ;;  %v1048_v16 = vpop.eup %1047 }
 0x331   :  { %v693_v24 = vmul.f32 %v1048_v16, %v1477_v32 }
 0x332   :  { %922 = vmatmul.msk.f32.gmra.mxu0 %vm63_vm0, %v692_v1 }
 0x334   :  { %v408_v47 = vpop.f32.mrf.mxu3 }
 0x33a   :  { %923 = vmatmul.msk.f32.gmra.mxu0 %vm63_vm0, %v693_v24 }
 0x33c   :  { %v411_v29 = vpop.f32.mrf.mxu3 }
 0x346   :  { %v679_v60 = vpop.xlane.xlu2 %678 }
 0x347   :  { %1049 = vrcp.f32 %v679_v60 }
 0x34a   :  { %v414_v40 = vpop.f32.mrf.mxu3 }
 0x34d   :  { %v1050_v34 = vpop.eup %1049 }
 0x34e   :  { %v682_v43 = vpop.xlane.xlu2 %681  ;;  %v697_v44 = vmul.f32 %v1050_v34, %v1504_v0 }
 0x34f   :  { %1051 = vrcp.f32 %v682_v43 }
 0x350   :  { %927 = vmatmul.msk.f32.gmra.mxu3 %vm63_vm0, %v697_v44 }
 0x352   :  { %v417_v49 = vpop.f32.mrf.mxu3 }
 0x355   :  { %v1052_v45 = vpop.eup %1051 }
 0x356   :  { %v698_v46 = vmul.f32 %v1052_v45, %v1509_v6 }
 0x358   :  { %928 = vmatmul.msk.f32.gmra.mxu3 %vm63_vm0, %v698_v46 }
 0x372   :  { %v461_v51 = vpop.f32.mrf.mxu3 }
 0x382   :  { %v464_v52 = vpop.f32.mrf.mxu3 }
 0x38a   :  { %v467_v55 = vpop.f32.mrf.mxu3 }
 0x38c   :  { %v793_v58 = vpop.f32.mrf.mxu2 }
 0x390   :  { %v740_v32 = vpop.f32.mrf.mxu0 }
 0x391   :  { %813 = vrot.lane.b32.xlu0 %v740_v32, %s1140_s28 }
 0x392   :  { %v470_v56 = vpop.f32.mrf.mxu3 }
 0x396   :  { %v749_v12 = vpop.f32.mrf.mxu1 }
 0x397   :  { %819 = vrot.lane.b32.xlu2 %v749_v12, %s1140_s28 }
 0x39a   :  { %v796_v23 = vpop.f32.mrf.mxu3 }
 0x3af   :  { %v743_v18 = vpop.f32.mrf.mxu0 }
 0x3b0   :  { %815 = vrot.lane.b32.xlu1 %v743_v18, %s1140_s28 }
 0x3b7   :  { %v746_v61 = vpop.f32.mrf.mxu0 }
 0x3b8   :  { %817 = vrot.lane.b32.xlu0 %v746_v61, %s1140_s28  ;;  %821 = vrot.lane.b32.xlu1 %v793_v58, %s1140_s28 }
 0x3c0   :  { %823 = vrot.lane.b32.xlu0 %v796_v23, %s1140_s28 }
 0x3d3   :  { %v799_v63 = vpop.f32.mrf.mxu3 }
 0x3d4   :  { %825 = vrot.lane.b32.xlu1 %v799_v63, %s1140_s28 }
 0x3db   :  { %v802_v41 = vpop.f32.mrf.mxu3 }
 0x3dc   :  { %827 = vrot.lane.b32.xlu0 %v802_v41, %s1140_s28 }
 0x3f1   :  { %v820_v4 = vpop.permute.xlu2 %819 }
 0x3f2   :  { %v840_v48 = vsel %vm152_vm1, %v417_v49, %v820_v4 }
 0x3f3   :  { %848 = vst.msk [vmem:[#allocation7 + $0x18] sm:$0xff] %vm63_vm0, %v840_v48 }
 0x403   :  { %v814_v0 = vpop.permute.xlu0 %813 }
 0x404   :  { %v837_v2 = vsel %vm152_vm1, %v408_v47, %v814_v0 }
 0x405   :  { %845 = vst.msk [vmem:[#allocation7] sm:$0xff] %vm63_vm0, %v837_v2 }
 0x422   :  { %v816_v6 = vpop.permute.xlu1 %815 }
 0x423   :  { %v838_v33 = vsel %vm152_vm1, %v411_v29, %v816_v6 }
 0x424   :  { %846 = vst.msk [vmem:[#allocation7 + $0x8] sm:$0xff] %vm63_vm0, %v838_v33 }
 0x42a   :  { %v818_v7 = vpop.permute.xlu0 %817  ;;  %v822_v9 = vpop.permute.xlu1 %821 }
 0x42b   :  { %v839_v5 = vsel %vm152_vm1, %v414_v40, %v818_v7  ;;  %v841_v38 = vsel %vm152_vm1, %v461_v51, %v822_v9 }
 0x42c   :  { %847 = vst.msk [vmem:[#allocation7 + $0x10] sm:$0xff] %vm63_vm0, %v839_v5 }
 0x42d   :  { %849 = vst.msk [vmem:[#allocation7 + $0x20] sm:$0xff] %vm63_vm0, %v841_v38 }
 0x432   :  { %v824_v54 = vpop.permute.xlu0 %823 }
 0x433   :  { %v842_v13 = vsel %vm152_vm1, %v464_v52, %v824_v54 }
 0x434   :  { %850 = vst.msk [vmem:[#allocation7 + $0x28] sm:$0xff] %vm63_vm0, %v842_v13 }
 0x446   :  { %v826_v14 = vpop.permute.xlu1 %825 }
 0x447   :  { %v843_v26 = vsel %vm152_vm1, %v467_v55, %v826_v14 }
 0x448   :  { %851 = vst.msk [vmem:[#allocation7 + $0x30] sm:$0xff] %vm63_vm0, %v843_v26 }
 0x44e   :  { %v828_v59 = vpop.permute.xlu0 %827 }
 0x44f   :  { %v844_v50 = vsel %vm152_vm1, %v470_v56, %v828_v59 }
 0x450   :  { %852 = vst.msk [vmem:[#allocation7 + $0x38] sm:$0xff] %vm63_vm0, %v844_v50 }
 0x451   :  { %865 = dma.vmem_to_hbm [thread:$0]  %s858_s30, 1024, %s860_s6, [#allocation4], %s1132_s20, %s1132_s20, %s1133_s21  }
 0x452   :  { %1129 = dma.done.wait [#allocation4], 1024  }
 0x453   :  { %1130 = vsyncadd [#allocation4], 4294966272 }
 0x454   :  { %870 = vsyncpa [#allocation3], 1 }
 0x455   :  { %871 = vsyncpa [#allocation6], 1 }
 0x456   :  { %872 = vsyncpa [#allocation4], 1 }

</bundles_post_ra>
